<compile_context>
chip_gen: v7x
topology: tpu7x:2x2x1
jax: 0.10.0
libtpu: 0.0.40
codegen_flags: <defaults>
</compile_context>

<pallas_src>
import jax
import jax.numpy as jnp
from jax import lax
from jax.experimental import pallas as pl
from jax.experimental.pallas import tpu as pltpu


_CHUNK = 512  # lanes per register-resident inner chunk: (C_out=8, 512) f32 = 4 vregs/slab


def _fmb_kernel(x_ref, w_ref, b_ref, o_ref):
    # x_ref: (1, C_in, ts)   lane-dense spatial streaming data
    # w_ref: (C_out, C_in)   tiny resident weights
    # b_ref: (C_out, 1)
    # o_ref: (1, C_out, ts)
    c_out, c_in = w_ref.shape
    ts = x_ref.shape[-1]
    ch = _CHUNK
    n_chunks = ts // ch  # wrapper guarantees ts % _CHUNK == 0

    w = w_ref[...].astype(jnp.float32)   # (C_out, C_in)
    b = b_ref[...].astype(jnp.float32)   # (C_out, 1)

    # Hoist the weight/bias lane broadcasts out of the chunk loop — JAX does not CSE
    # broadcast_in_dim, so doing this inside the loop would re-emit them every chunk.
    wb = [jnp.broadcast_to(w[:, ci:ci + 1], (c_out, ch)) for ci in range(c_in)]
    bb = jnp.broadcast_to(b, (c_out, ch))

    def body(c, carry):
        off = pl.multiple_of(c * ch, ch)
        x_c = x_ref[0, :, pl.ds(off, ch)].astype(jnp.float32)   # (C_in, ch)
        # Unrolled VPU FMA chain over input channels; bias folded into the first term.
        # The (1, ch) -> (C_out, ch) sublane broadcast rides the XLU slots (co-issues
        # with the VALU FMAs); a pl.ds(..., stride=0) broadcast-load is a possible
        # further micro-opt once at the HBM roofline.
        acc = bb + wb[0] * x_c[0:1, :]
        for ci in range(1, c_in):
            acc = acc + wb[ci] * x_c[ci:ci + 1, :]
        o_ref[0, :, pl.ds(off, ch)] = acc.astype(o_ref.dtype)
        return carry

    lax.fori_loop(0, n_chunks, body, 0, unroll=min(4, n_chunks))


def feature_map_block(x, weight, bias, *, ts=65536):
    """1x1x1 Conv3d forward (FeatureMapBlock).

    x:      (N, C_in, D, H, W)
    weight: (C_out, C_in, 1, 1, 1)
    bias:   (C_out,)
    returns (N, C_out, D, H, W), same dtype as x (f32 accumulation in-kernel).
    """
    N, C_in, D, H, W = x.shape
    C_out = weight.shape[0]
    S = D * H * W

    # Spatial tile: multiple of _CHUNK lanes (=> multiple of 128: satisfies the (8,128)
    # tiling rule and keeps stores lane-dense/unmasked), clamped to the chunk-rounded
    # spatial extent so small problems run in N grid steps.
    ts = max(_CHUNK, (int(ts) // _CHUNK) * _CHUNK)
    ts = min(ts, pl.cdiv(S, _CHUNK) * _CHUNK)
    num_s = pl.cdiv(S, ts)

    # Free reshape: NCDHW stays contiguous; spatial axis becomes the last (lane) dim.
    # No padding and no post-slice — the cdiv grid's ragged last block is masked by Pallas.
    x3 = x.reshape(N, C_in, S)
    w_mat = weight.reshape(C_out, C_in)   # (C_out, C_in)
    b_col = bias.reshape(C_out, 1)        # (C_out, 1)

    out3 = pl.pallas_call(
        _fmb_kernel,
        out_shape=jax.ShapeDtypeStruct((N, C_out, S), x.dtype),
        grid_spec=pltpu.PrefetchScalarGridSpec(
            num_scalar_prefetch=0,
            grid=(N, num_s),
            in_specs=[
                pl.BlockSpec((1, C_in, ts), lambda n, s: (n, 0, s)),
                pl.BlockSpec((C_out, C_in), lambda n, s: (0, 0)),
                pl.BlockSpec((C_out, 1), lambda n, s: (0, 0)),
            ],
            out_specs=pl.BlockSpec((1, C_out, ts), lambda n, s: (n, 0, s)),
        ),
        compiler_params=pltpu.CompilerParams(
            dimension_semantics=("parallel", "parallel"),
        ),
    )(x3, w_mat, b_col)

    return out3.reshape(N, C_out, D, H, W)


def _reference(x, weight, bias):
    C_out, C_in = weight.shape[0], weight.shape[1]
    return (
        jnp.einsum("ncdhw,oc->nodhw", x, weight.reshape(C_out, C_in))
        + bias[None, :, None, None, None]
    )


if __name__ == "__main__":
    key = jax.random.PRNGKey(0)
    k_x, k_w, k_b, k_x2 = jax.random.split(key, 4)

    # Main test: batch=2, C_in=4, C_out=8, D=8, H=16, W=16 -> S=2048 (grid = (2, 1)).
    N, C_in, C_out, D, H, W = 2, 4, 8, 8, 16, 16
    x = jax.random.normal(k_x, (N, C_in, D, H, W), dtype=jnp.float32)
    weight = jax.random.normal(k_w, (C_out, C_in, 1, 1, 1), dtype=jnp.float32) * 0.1
    bias = jax.random.normal(k_b, (C_out,), dtype=jnp.float32) * 0.1

    out = feature_map_block(x, weight, bias)
    out = jax.block_until_ready(out)
    ref = _reference(x, weight, bias)
    assert out.shape == (N, C_out, D, H, W)
    assert jnp.allclose(out, ref, atol=1e-4, rtol=1e-4)

    # Ragged-grid test (no pad/slice path): S = 2176 with ts=512 -> grid (1, 5),
    # last spatial block partially out of range and masked on store.
    x2 = jax.random.normal(k_x2, (1, C_in, 1, 17, 128), dtype=jnp.float32)
    out2 = feature_map_block(x2, weight, bias, ts=512)
    out2 = jax.block_until_ready(out2)
    ref2 = _reference(x2, weight, bias)
    assert out2.shape == (1, C_out, 1, 17, 128)
    assert jnp.allclose(out2, ref2, atol=1e-4, rtol=1e-4)

    print("KERNEL_OK")
</pallas_src>

<mosaic_0001>
module attributes {stable_mosaic.version = 11 : i64} {
  func.func @_fmb_kernel(%arg0: i32, %arg1: i32, %arg2: memref<1x4x2048xf32, #tpu.memory_space<vmem>>, %arg3: memref<8x4xf32, #tpu.memory_space<vmem>>, %arg4: memref<8x1xf32, #tpu.memory_space<vmem>>, %arg5: memref<1x8x2048xf32, #tpu.memory_space<vmem>>) attributes {dimension_semantics = [#tpu.dimension_semantics<parallel>, #tpu.dimension_semantics<parallel>], iteration_bounds = array<i64: 2, 1>, scalar_prefetch = 0 : i64, scratch_operands = 0 : i64, tpu.core_type = #tpu.core_type<tc>, window_params = [{transform_indices = @transform_0, window_bounds = array<i64: 1, 4, 2048>}, {pipeline_mode = #tpu.pipeline_mode<synchronous>, transform_indices = @transform_1, window_bounds = array<i64: 8, 4>}, {pipeline_mode = #tpu.pipeline_mode<synchronous>, transform_indices = @transform_2, window_bounds = array<i64: 8, 1>}, {transform_indices = @transform_3, window_bounds = array<i64: 1, 8, 2048>}]} {
    %c0 = arith.constant 0 : index
    %c0_0 = arith.constant 0 : index
    %0 = vector.load %arg3[%c0, %c0_0] : memref<8x4xf32, #tpu.memory_space<vmem>>, vector<8x4xf32>
    %c0_1 = arith.constant 0 : index
    %c0_2 = arith.constant 0 : index
    %1 = vector.load %arg4[%c0_1, %c0_2] : memref<8x1xf32, #tpu.memory_space<vmem>>, vector<8x1xf32>
    %2 = vector.extract_strided_slice %0 {offsets = [0, 0], sizes = [8, 1], strides = [1, 1]} : vector<8x4xf32> to vector<8x1xf32>
    %3 = vector.shape_cast %2 : vector<8x1xf32> to vector<8x1xf32>
    %4 = vector.broadcast %3 : vector<8x1xf32> to vector<8x512xf32>
    %5 = vector.extract_strided_slice %0 {offsets = [0, 1], sizes = [8, 1], strides = [1, 1]} : vector<8x4xf32> to vector<8x1xf32>
    %6 = vector.shape_cast %5 : vector<8x1xf32> to vector<8x1xf32>
    %7 = vector.broadcast %6 : vector<8x1xf32> to vector<8x512xf32>
    %8 = vector.extract_strided_slice %0 {offsets = [0, 2], sizes = [8, 1], strides = [1, 1]} : vector<8x4xf32> to vector<8x1xf32>
    %9 = vector.shape_cast %8 : vector<8x1xf32> to vector<8x1xf32>
    %10 = vector.broadcast %9 : vector<8x1xf32> to vector<8x512xf32>
    %11 = vector.extract_strided_slice %0 {offsets = [0, 3], sizes = [8, 1], strides = [1, 1]} : vector<8x4xf32> to vector<8x1xf32>
    %12 = vector.shape_cast %11 : vector<8x1xf32> to vector<8x1xf32>
    %13 = vector.broadcast %12 : vector<8x1xf32> to vector<8x512xf32>
    %14 = vector.shape_cast %1 : vector<8x1xf32> to vector<8x1xf32>
    %15 = vector.broadcast %14 : vector<8x1xf32> to vector<8x512xf32>
    %c0_i32 = arith.constant 0 : i32
    %c512_i32 = arith.constant 512 : i32
    %16 = arith.muli %c0_i32, %c512_i32 : i32
    %17 = tpu.assume_multiple %16, 512 : i32
    %c0_3 = arith.constant 0 : index
    %c0_4 = arith.constant 0 : index
    %18 = arith.index_cast %17 : i32 to index
    %19 = vector.load %arg2[%c0_3, %c0_4, %18] : memref<1x4x2048xf32, #tpu.memory_space<vmem>>, vector<1x4x512xf32>
    %20 = vector.shape_cast %19 : vector<1x4x512xf32> to vector<4x512xf32>
    %21 = vector.extract_strided_slice %20 {offsets = [0, 0], sizes = [1, 512], strides = [1, 1]} : vector<4x512xf32> to vector<1x512xf32>
    %22 = vector.broadcast %21 : vector<1x512xf32> to vector<8x512xf32>
    %23 = arith.mulf %4, %22 : vector<8x512xf32>
    %24 = arith.addf %15, %23 : vector<8x512xf32>
    %25 = vector.extract_strided_slice %20 {offsets = [1, 0], sizes = [1, 512], strides = [1, 1]} : vector<4x512xf32> to vector<1x512xf32>
    %26 = vector.broadcast %25 : vector<1x512xf32> to vector<8x512xf32>
    %27 = arith.mulf %7, %26 : vector<8x512xf32>
    %28 = arith.addf %24, %27 : vector<8x512xf32>
    %29 = vector.extract_strided_slice %20 {offsets = [2, 0], sizes = [1, 512], strides = [1, 1]} : vector<4x512xf32> to vector<1x512xf32>
    %30 = vector.broadcast %29 : vector<1x512xf32> to vector<8x512xf32>
    %31 = arith.mulf %10, %30 : vector<8x512xf32>
    %32 = arith.addf %28, %31 : vector<8x512xf32>
    %33 = vector.extract_strided_slice %20 {offsets = [3, 0], sizes = [1, 512], strides = [1, 1]} : vector<4x512xf32> to vector<1x512xf32>
    %34 = vector.broadcast %33 : vector<1x512xf32> to vector<8x512xf32>
    %35 = arith.mulf %13, %34 : vector<8x512xf32>
    %36 = arith.addf %32, %35 : vector<8x512xf32>
    %c0_5 = arith.constant 0 : index
    %c0_6 = arith.constant 0 : index
    %37 = arith.index_cast %17 : i32 to index
    %38 = vector.load %arg5[%c0_5, %c0_6, %37] : memref<1x8x2048xf32, #tpu.memory_space<vmem>>, vector<1x8x512xf32>
    %39 = vector.shape_cast %38 : vector<1x8x512xf32> to vector<8x512xf32>
    %40 = vector.shape_cast %36 : vector<8x512xf32> to vector<1x8x512xf32>
    tpu.vector_store %arg5[%c0_5, %c0_6, %37], %40 {strides = array<i32>} : memref<1x8x2048xf32, #tpu.memory_space<vmem>>, vector<1x8x512xf32>,
    %c1_i32 = arith.constant 1 : i32
    %c512_i32_7 = arith.constant 512 : i32
    %41 = arith.muli %c1_i32, %c512_i32_7 : i32
    %42 = tpu.assume_multiple %41, 512 : i32
    %c0_8 = arith.constant 0 : index
    %c0_9 = arith.constant 0 : index
    %43 = arith.index_cast %42 : i32 to index
    %44 = vector.load %arg2[%c0_8, %c0_9, %43] : memref<1x4x2048xf32, #tpu.memory_space<vmem>>, vector<1x4x512xf32>
    %45 = vector.shape_cast %44 : vector<1x4x512xf32> to vector<4x512xf32>
    %46 = vector.extract_strided_slice %45 {offsets = [0, 0], sizes = [1, 512], strides = [1, 1]} : vector<4x512xf32> to vector<1x512xf32>
    %47 = vector.broadcast %46 : vector<1x512xf32> to vector<8x512xf32>
    %48 = arith.mulf %4, %47 : vector<8x512xf32>
    %49 = arith.addf %15, %48 : vector<8x512xf32>
    %50 = vector.extract_strided_slice %45 {offsets = [1, 0], sizes = [1, 512], strides = [1, 1]} : vector<4x512xf32> to vector<1x512xf32>
    %51 = vector.broadcast %50 : vector<1x512xf32> to vector<8x512xf32>
    %52 = arith.mulf %7, %51 : vector<8x512xf32>
    %53 = arith.addf %49, %52 : vector<8x512xf32>
    %54 = vector.extract_strided_slice %45 {offsets = [2, 0], sizes = [1, 512], strides = [1, 1]} : vector<4x512xf32> to vector<1x512xf32>
    %55 = vector.broadcast %54 : vector<1x512xf32> to vector<8x512xf32>
    %56 = arith.mulf %10, %55 : vector<8x512xf32>
    %57 = arith.addf %53, %56 : vector<8x512xf32>
    %58 = vector.extract_strided_slice %45 {offsets = [3, 0], sizes = [1, 512], strides = [1, 1]} : vector<4x512xf32> to vector<1x512xf32>
    %59 = vector.broadcast %58 : vector<1x512xf32> to vector<8x512xf32>
    %60 = arith.mulf %13, %59 : vector<8x512xf32>
    %61 = arith.addf %57, %60 : vector<8x512xf32>
    %c0_10 = arith.constant 0 : index
    %c0_11 = arith.constant 0 : index
    %62 = arith.index_cast %42 : i32 to index
    %63 = vector.load %arg5[%c0_10, %c0_11, %62] : memref<1x8x2048xf32, #tpu.memory_space<vmem>>, vector<1x8x512xf32>
    %64 = vector.shape_cast %63 : vector<1x8x512xf32> to vector<8x512xf32>
    %65 = vector.shape_cast %61 : vector<8x512xf32> to vector<1x8x512xf32>
    tpu.vector_store %arg5[%c0_10, %c0_11, %62], %65 {strides = array<i32>} : memref<1x8x2048xf32, #tpu.memory_space<vmem>>, vector<1x8x512xf32>,
    %c2_i32 = arith.constant 2 : i32
    %c512_i32_12 = arith.constant 512 : i32
    %66 = arith.muli %c2_i32, %c512_i32_12 : i32
    %67 = tpu.assume_multiple %66, 512 : i32
    %c0_13 = arith.constant 0 : index
    %c0_14 = arith.constant 0 : index
    %68 = arith.index_cast %67 : i32 to index
    %69 = vector.load %arg2[%c0_13, %c0_14, %68] : memref<1x4x2048xf32, #tpu.memory_space<vmem>>, vector<1x4x512xf32>
    %70 = vector.shape_cast %69 : vector<1x4x512xf32> to vector<4x512xf32>
    %71 = vector.extract_strided_slice %70 {offsets = [0, 0], sizes = [1, 512], strides = [1, 1]} : vector<4x512xf32> to vector<1x512xf32>
    %72 = vector.broadcast %71 : vector<1x512xf32> to vector<8x512xf32>
    %73 = arith.mulf %4, %72 : vector<8x512xf32>
    %74 = arith.addf %15, %73 : vector<8x512xf32>
    %75 = vector.extract_strided_slice %70 {offsets = [1, 0], sizes = [1, 512], strides = [1, 1]} : vector<4x512xf32> to vector<1x512xf32>
    %76 = vector.broadcast %75 : vector<1x512xf32> to vector<8x512xf32>
    %77 = arith.mulf %7, %76 : vector<8x512xf32>
    %78 = arith.addf %74, %77 : vector<8x512xf32>
    %79 = vector.extract_strided_slice %70 {offsets = [2, 0], sizes = [1, 512], strides = [1, 1]} : vector<4x512xf32> to vector<1x512xf32>
    %80 = vector.broadcast %79 : vector<1x512xf32> to vector<8x512xf32>
    %81 = arith.mulf %10, %80 : vector<8x512xf32>
    %82 = arith.addf %78, %81 : vector<8x512xf32>
    %83 = vector.extract_strided_slice %70 {offsets = [3, 0], sizes = [1, 512], strides = [1, 1]} : vector<4x512xf32> to vector<1x512xf32>
    %84 = vector.broadcast %83 : vector<1x512xf32> to vector<8x512xf32>
    %85 = arith.mulf %13, %84 : vector<8x512xf32>
    %86 = arith.addf %82, %85 : vector<8x512xf32>
    %c0_15 = arith.constant 0 : index
    %c0_16 = arith.constant 0 : index
    %87 = arith.index_cast %67 : i32 to index
    %88 = vector.load %arg5[%c0_15, %c0_16, %87] : memref<1x8x2048xf32, #tpu.memory_space<vmem>>, vector<1x8x512xf32>
    %89 = vector.shape_cast %88 : vector<1x8x512xf32> to vector<8x512xf32>
    %90 = vector.shape_cast %86 : vector<8x512xf32> to vector<1x8x512xf32>
    tpu.vector_store %arg5[%c0_15, %c0_16, %87], %90 {strides = array<i32>} : memref<1x8x2048xf32, #tpu.memory_space<vmem>>, vector<1x8x512xf32>,
    %c3_i32 = arith.constant 3 : i32
    %c512_i32_17 = arith.constant 512 : i32
    %91 = arith.muli %c3_i32, %c512_i32_17 : i32
    %92 = tpu.assume_multiple %91, 512 : i32
    %c0_18 = arith.constant 0 : index
    %c0_19 = arith.constant 0 : index
    %93 = arith.index_cast %92 : i32 to index
    %94 = vector.load %arg2[%c0_18, %c0_19, %93] : memref<1x4x2048xf32, #tpu.memory_space<vmem>>, vector<1x4x512xf32>
    %95 = vector.shape_cast %94 : vector<1x4x512xf32> to vector<4x512xf32>
    %96 = vector.extract_strided_slice %95 {offsets = [0, 0], sizes = [1, 512], strides = [1, 1]} : vector<4x512xf32> to vector<1x512xf32>
    %97 = vector.broadcast %96 : vector<1x512xf32> to vector<8x512xf32>
    %98 = arith.mulf %4, %97 : vector<8x512xf32>
    %99 = arith.addf %15, %98 : vector<8x512xf32>
    %100 = vector.extract_strided_slice %95 {offsets = [1, 0], sizes = [1, 512], strides = [1, 1]} : vector<4x512xf32> to vector<1x512xf32>
    %101 = vector.broadcast %100 : vector<1x512xf32> to vector<8x512xf32>
    %102 = arith.mulf %7, %101 : vector<8x512xf32>
    %103 = arith.addf %99, %102 : vector<8x512xf32>
    %104 = vector.extract_strided_slice %95 {offsets = [2, 0], sizes = [1, 512], strides = [1, 1]} : vector<4x512xf32> to vector<1x512xf32>
    %105 = vector.broadcast %104 : vector<1x512xf32> to vector<8x512xf32>
    %106 = arith.mulf %10, %105 : vector<8x512xf32>
    %107 = arith.addf %103, %106 : vector<8x512xf32>
    %108 = vector.extract_strided_slice %95 {offsets = [3, 0], sizes = [1, 512], strides = [1, 1]} : vector<4x512xf32> to vector<1x512xf32>
    %109 = vector.broadcast %108 : vector<1x512xf32> to vector<8x512xf32>
    %110 = arith.mulf %13, %109 : vector<8x512xf32>
    %111 = arith.addf %107, %110 : vector<8x512xf32>
    %c0_20 = arith.constant 0 : index
    %c0_21 = arith.constant 0 : index
    %112 = arith.index_cast %92 : i32 to index
    %113 = vector.load %arg5[%c0_20, %c0_21, %112] : memref<1x8x2048xf32, #tpu.memory_space<vmem>>, vector<1x8x512xf32>
    %114 = vector.shape_cast %113 : vector<1x8x512xf32> to vector<8x512xf32>
    %115 = vector.shape_cast %111 : vector<8x512xf32> to vector<1x8x512xf32>
    tpu.vector_store %arg5[%c0_20, %c0_21, %112], %115 {strides = array<i32>} : memref<1x8x2048xf32, #tpu.memory_space<vmem>>, vector<1x8x512xf32>,
    %c4_i32 = arith.constant 4 : i32
    return
  }
  func.func @transform_0(%arg0: i32, %arg1: i32) -> (i32, i32, i32) {
    %c0_i32 = arith.constant 0 : i32
    %c0_i32_0 = arith.constant 0 : i32
    return %arg0, %c0_i32, %arg1 : i32, i32, i32
  }
  func.func @transform_1(%arg0: i32, %arg1: i32) -> (i32, i32) {
    %c0_i32 = arith.constant 0 : i32
    %c0_i32_0 = arith.constant 0 : i32
    %c0_i32_1 = arith.constant 0 : i32
    return %c0_i32, %c0_i32_0 : i32, i32
  }
  func.func @transform_2(%arg0: i32, %arg1: i32) -> (i32, i32) {
    %c0_i32 = arith.constant 0 : i32
    %c0_i32_0 = arith.constant 0 : i32
    %c0_i32_1 = arith.constant 0 : i32
    return %c0_i32, %c0_i32_0 : i32, i32
  }
  func.func @transform_3(%arg0: i32, %arg1: i32) -> (i32, i32, i32) {
    %c0_i32 = arith.constant 0 : i32
    %c0_i32_0 = arith.constant 0 : i32
    return %arg0, %c0_i32, %arg1 : i32, i32, i32
  }
}

</mosaic_0001>

<bundles_post_ra>
// kernel: tpu_custom_call.1
= control target key start
LH: loop header
LB: loop body
LE: loop exit
PB: predicated region body
PF: predicated region fallthrough
CT: control target
= control target key end

     0   :  { %8 = vsyncpa [#allocation3], 0  ;;  %s1967_s0 = inlined_call_operand.hbm [shape: f32[2,4,2048], index: 0, kind: input, shape index: {}]   ;;  %s1968_s1 = inlined_call_operand.vmem [shape: f32[8,4], index: 1, kind: input, shape index: {}]   ;;  %s1969_s2 = inlined_call_operand.vmem [shape: f32[8,1], index: 2, kind: input, shape index: {}]   ;;  %s1970_s3 = inlined_call_operand.hbm [shape: f32[2,8,2048], index: 3, kind: output, shape index: {}]  }
   0x1   :  { %10 = vsyncpa [#allocation3 + $0x1], 0 }
   0x2   :  { %11 = vsyncpa [#allocation4], 0 }
   0x3   :  { %13 = vsyncpa [#allocation4 + $0x1], 0  ;;  %s1321_s12 = smov 0   ;;  %s1323_s13 = smov 0  }
   0x4   :  { %s1325_s14 = smov 0   ;;  %s1327_s15 = smov 0  }
   0x5   :  { %s1329_s16 = smov 0   ;;  %s1331_s17 = smov 0  }
   0x6 LB: > { %s1074_s18 = sadd.s32 4294967295, %s1293_s17   ;;  %s1075_s19 = sadd.s32 4294967294, %s1293_s17   ;;  %s1293_s17 = sphi %s1331_s17, %s19_s17   ;;  %s1289_s16 = sphi %s1329_s16, %s2020_s16   ;;  %s1285_s15 = sphi %s1327_s15, %s2019_s15   ;;  %s1281_s14 = sphi %s1325_s14, %s2018_s14   ;;  %s1277_s13 = sphi %s1323_s13, %s2017_s13   ;;  %s1273_s12 = sphi %s1321_s12, %s2016_s12  }
   0x7   : > { %s31_s20 = sadd.s32 1, %s1289_s16  ;;  %s40_s21 = sadd.s32 1, %s1281_s14 }
   0x8   : > { %p33_p0 = scmp.ge.s32.totalorder %s31_s20, 2  ;;  %p47_p1 = scmp.ne.s32.totalorder %s1281_s14, %s1277_s13 }
   0x9   : > { %p48_p2 = scmp.eq.s32.totalorder %s1293_s17, 0  ;;  %p53_p3 = scmp.ne.s32.totalorder %s1277_s13, %s1273_s12 }
   0xa   : > { %s2022_s20 = smov (%p33_p0, %s31_s20), 0  ;;  %p54_p5 = scmp.eq.s32.totalorder %s1074_s18, 0 }
   0xb   : > { %p1362_p4 = por %p48_p2, %p47_p1  ;;  %s35_s23 = ssub.s32 %s1289_s16, %s2022_s20 }
   0xc   : > { %p121_p6 = scmp.eq.s32.totalorder %s1074_s18, 1  ;;  %p38_p7 = scmp.eq.s32.totalorder %s35_s23, 0 }
   0xd   : > { %p1368_p8 = por %p54_p5, %p53_p3  ;;  %p127_p10 = scmp.eq.s32.totalorder %s1075_s19, 1 }
   0xe   : > { %p1372_p9 = por %p121_p6, %p47_p1  ;;  %p1121_p13 = scmp.lt.s32.totalorder %s1293_s17, 2 }
   0xf   : > { %s1377_s26 = scalar_select %p38_p7, %s1281_s14, %s40_s21  }
  0x10   : > { %s1974_s25 = scalar_select %p1372_p9, 1, 0 }
  0x11   : > { %p1379_p11 = por %p127_p10, %p53_p3  ;;  %s153_s28 = sand.u32 1, %s1281_s14  }
  0x12   : > { %s1078_s29 = sshll.u32 %s153_s28, 6  ;;  %s1107_s30 = sshll.u32 %s1289_s16, 10 }
  0x13   : > { %s1975_s27 = scalar_select %p1379_p11, 1, 0 }
  0x14   : > { %s1390_s6 = scalar_lea.hbm %s1967_s0, %s1107_s30  ;;  %s157_s7 = scalar_lea.vmem [#allocation2], %s1078_s29 }
  0x15   : > { %s167_s8 = sshll.u32 %s157_s7, 4  ;;  %p1396_p0 = pnand %p1121_p13, %p1362_p4  ;;  %s1392_s8 = int_to_ptr.vmem [resolvable:$true] %s167_s8 }
  0x16   : > { %s154_s10 = scalar_lea.sflag [#allocation3], %s153_s28  ;;  %s1181_s11 = scalar_lea.hbm %s1390_s6, 1024 }
  0x17   : > { %p1182_p3 = scmp.ne.s32.totalorder %s1390_s6, %s1181_s11  ;;  %p1183_p5 = pneg %p1396_p0 }
  0x18   : > { %s1186_s21 = scalar_lea.hbm %s1967_s0, 2048  ;;  %p1187_p4 = scmp.lt.u32.totalorder %s1390_s6, %s1967_s0 }
  0x19   : > { %p1184_p6 = pnand %p1183_p5, %p1182_p3  ;;  %p1188_p10 = scmp.lt.u32.totalorder %s1186_s21, %s1181_s11 }
  0x1a   : > { %p1190_p12 = scmp.lt.u32.totalorder %s1181_s11, %s1390_s6 }
  0x1b   : > { %p1185_p7 = pneg %p1184_p6  ;;  %p1189_p13 = por %p1188_p10, %p1187_p4 }
  0x1d   : > { %p1191_p1 = por %p1190_p12, %p1189_p13 }
  0x1f   : > { %p1192_p2 = pnand %p1191_p1, %p1185_p7 }
  0x21   : > { %1195 = shalt.err (!%p1192_p2)
}
  0x22   : > { %s1196_s28 = scalar_lea.vmem %s1392_s8, 1024  ;;  %s1295_s29 = smov [#allocation2]  }
  0x23   : > { %p1197_p3 = scmp.ne.s32.totalorder %s1392_s8, %s1196_s28  ;;  %s1201_s30 = sshll.u32 %s1295_s29, 4  ;;  %s1202_s30 = int_to_ptr.vmem [resolvable:$false] %s1201_s30 }
  0x24   : > { %s1203_s4 = scalar_lea.vmem %s1202_s30, 2048  ;;  %p1204_p9 = scmp.lt.s32.totalorder %s1392_s8, %s1202_s30 }
  0x25   : > { %p1199_p6 = pnand %p1197_p3, %p1183_p5  ;;  %p1205_p4 = scmp.lt.s32.totalorder %s1203_s4, %s1196_s28 }
  0x27   : > { %p1200_p11 = pneg %p1199_p6  ;;  %p1206_p10 = por %p1205_p4, %p1204_p9 }
  0x29   : > { %p1207_p12 = pnand %p1206_p10, %p1200_p11 }
  0x2b   : > { %1210 = shalt.err (!%p1207_p12)
}
  0x2c   : > { %1116 = dma.hbm_to_vmem [thread:$0]  (!%p1396_p0), %s1390_s6, 1024, %s1392_s8, %s154_s10  }
  0x2d   : > { %p1977_p1 = scmp.lt.s32.totalorder %s1293_s17, 3  ;;  %p1978_p2 = scmp.ge.s32.totalorder %s1293_s17, 1 }
  0x2f   : > { %p173_p5 = pnand %p1978_p2, %p1977_p1 }
  0x31   : > { %176 = sbr.rel (%p173_p5) target bundleno = 240 (0xf0), region = 32 }
  0x38   : > { %s1432_s5 = sand.u32 1, %s1277_s13  }
  0x39   : > { %s1082_s7 = sshll.u32 %s1432_s5, 6  ;;  %s179_s11 = scalar_lea.sflag [#allocation3], %s1432_s5 }
  0x3a   : > { %s1436_s18 = scalar_lea.vmem [#allocation2], %s1082_s7 }
  0x3b   : > { %1264 = dma.done.wait (%p1368_p8), %s179_s11, 1024  }
  0x3c   : > { %1266 = vsyncadd (%p1368_p8), %s179_s11, 4294966272  ;;  %v1296_v0 = vmov 0   ;;  %v208_v1 = vld [vmem:[%s1969_s2] sm:$0xff]  ;;  %v1297_v3 = vmov 2   ;;  %v1298_v4 = vmov 1   ;;  %v1299_v5 = vmov 3  }
  0x3d   : > { %1177 = vset.pattern.permute.xlu1 %v1296_v0  ;;  %1175 = vset.pattern.permute.xlu0 %v1296_v0  ;;  %v207_v2 = vld [vmem:[%s1968_s1] sm:$0xff]  ;;  %v235_v6 = vlaneseq  ;;  %v1460_v11 = vld [vmem:[%s1436_s18 + $0x8] sm:$0xff]  ;;  %v1479_v19 = vld [vmem:[%s1436_s18 + $0x10] sm:$0xff]  ;;  %s1083_s24 = sshll.u32 %s1432_s5, 7  ;;  %s1108_s21 = sshll.u32 %s1285_s15, 11 }
  0x3e   : > { %228 = vperm.xlu1 %1177, %v208_v1   ;;  %211 = vperm.xlu0 %1175, %v207_v2   ;;  %v1457_v10 = vld [vmem:[%s1436_s18] sm:$0xff]  ;;  %v1482_v20 = vld [vmem:[%s1436_s18 + $0x18] sm:$0xff]  ;;  %v1534_v41 = vld [vmem:[%s1436_s18 + $0x28] sm:$0xff]  ;;  %s1883_s19 = scalar_lea.vmem [#allocation5], %s1083_s24  ;;  %s1914_s28 = scalar_lea.hbm %s1970_s3, %s1108_s21 }
  0x3f   : > { %v1448_v7 = vshrl.u32 %v235_v6, 7  ;;  %v1511_v32 = vld [vmem:[%s1436_s18 + $0x20] sm:$0xff]  ;;  %v1569_v54 = vld [vmem:[%s1436_s18 + $0x30] sm:$0xff]  ;;  %v1572_v55 = vld [vmem:[%s1436_s18 + $0x38] sm:$0xff]  ;;  %s990_s22 = sshll.u32 %s1883_s19, 4  ;;  %s974_s29 = scalar_lea.sflag [#allocation4], %s1432_s5  ;;  %s1916_s22 = int_to_ptr.vmem [resolvable:$true] %s990_s22 }
  0x40   : > { %s1211_s30 = scalar_lea.vmem %s1916_s22, 2048  ;;  %p2013_p9 = scmp.ne.s32.totalorder %s1974_s25, 0 }
  0x41   : > { %v1451_v8 = vsub.s32 0, %v1448_v7  ;;  %v1454_v9 = vsub.s32 4, %v1448_v7  ;;  %v1463_v12 = vsub.s32 1, %v1448_v7  ;;  %v1466_v13 = vsub.s32 5, %v1448_v7  ;;  %p1212_p8 = scmp.ne.s32.totalorder %s1916_s22, %s1211_s30  ;;  %s1300_s4 = smov [#allocation5]  }
  0x42   : > { %1178 = vset.pattern.permute.xlu1 %v1297_v3  ;;  %1176 = vset.pattern.permute.xlu0 %v1298_v4  ;;  %v1489_v23 = vsub.s32 2, %v1448_v7  ;;  %v1540_v43 = vsub.s32 3, %v1448_v7  ;;  %s1215_s7 = sshll.u32 %s1300_s4, 4  ;;  %s1216_s7 = int_to_ptr.vmem [resolvable:$false] %s1215_s7 }
  0x43   : > { %219 = vperm.xlu1 %1178, %v207_v2   ;;  %215 = vperm.xlu0 %1176, %v207_v2   ;;  %v238_v14 = vrot.slane %v1457_v10, %v1451_v8  ;;  %v242_v15 = vrot.slane %v1457_v10, %v1454_v9  ;;  %v246_v16 = vrot.slane %v1460_v11, %v1451_v8  ;;  %p1213_p11 = pnand %p1212_p8, %p2013_p9  ;;  %s1217_s11 = scalar_lea.vmem %s1216_s7, 4096 }
  0x44   : > { %v250_v17 = vrot.slane %v1460_v11, %v1454_v9  ;;  %v282_v18 = vrot.slane %v1457_v10, %v1463_v12  ;;  %v286_v21 = vrot.slane %v1457_v10, %v1466_v13  ;;  %v290_v22 = vrot.slane %v1460_v11, %v1463_v12  ;;  %p1218_p7 = scmp.lt.s32.totalorder %s1916_s22, %s1216_s7  ;;  %p1219_p13 = scmp.lt.s32.totalorder %s1217_s11, %s1211_s30 }
  0x45   : > { %v1492_v24 = vrot.slane %v238_v14, %v1451_v8  ;;  %v1495_v25 = vrot.slane %v242_v15, %v1451_v8  ;;  %v1498_v26 = vrot.slane %v246_v16, %v1451_v8  ;;  %v294_v27 = vrot.slane %v1460_v11, %v1466_v13  ;;  %p1214_p0 = pneg %p1213_p11 }
  0x46   : > { %v423_v28 = vrot.slane %v1479_v19, %v1451_v8  ;;  %v427_v29 = vrot.slane %v1479_v19, %v1454_v9  ;;  %v431_v30 = vrot.slane %v1482_v20, %v1451_v8  ;;  %v435_v31 = vrot.slane %v1482_v20, %v1454_v9  ;;  %p1220_p3 = por %p1219_p13, %p1218_p7 }
  0x47   : > { %1179 = vset.pattern.permute.xlu1 %v1299_v5  ;;  %1180 = vset.pattern.permute.xlu0 %v1296_v0  ;;  %v1514_v33 = vrot.slane %v250_v17, %v1451_v8  ;;  %v1517_v34 = vrot.slane %v282_v18, %v1463_v12  ;;  %v467_v35 = vrot.slane %v1479_v19, %v1463_v12 }
  0x48   : > { %223 = vperm.xlu1 %1179, %v207_v2   ;;  %v471_v36 = vrot.slane %v1479_v19, %v1466_v13  ;;  %v1524_v37 = vrot.slane %v286_v21, %v1463_v12  ;;  %v1527_v38 = vrot.slane %v290_v22, %v1463_v12  ;;  %v475_v39 = vrot.slane %v1482_v20, %v1463_v12  ;;  %p1221_p6 = pnand %p1220_p3, %p1214_p0 }
  0x49   : > { %v479_v40 = vrot.slane %v1482_v20, %v1466_v13  ;;  %v1537_v42 = vrot.slane %v294_v27, %v1463_v12  ;;  %v609_v44 = vrot.slane %v1511_v32, %v1451_v8  ;;  %v613_v45 = vrot.slane %v1511_v32, %v1454_v9 }
  0x4a   : > { %v1547_v46 = vrot.slane %v423_v28, %v1451_v8  ;;  %v1550_v47 = vrot.slane %v427_v29, %v1451_v8  ;;  %v1553_v48 = vrot.slane %v431_v30, %v1451_v8  ;;  %v1556_v49 = vrot.slane %v435_v31, %v1451_v8 }
  0x4b   : > { %v1559_v50 = vrot.slane %v467_v35, %v1463_v12  ;;  %v1562_v51 = vrot.slane %v471_v36, %v1463_v12  ;;  %v617_v52 = vrot.slane %v1534_v41, %v1451_v8  ;;  %v621_v53 = vrot.slane %v1534_v41, %v1454_v9 }
  0x4c   : > { %v1575_v56 = vrot.slane %v475_v39, %v1463_v12  ;;  %v1578_v57 = vrot.slane %v479_v40, %v1463_v12  ;;  %v653_v58 = vrot.slane %v1511_v32, %v1463_v12  ;;  %v657_v59 = vrot.slane %v1511_v32, %v1466_v13 }
  0x4d   : > { %v1585_v60 = vrot.slane %v609_v44, %v1451_v8  ;;  %v1588_v61 = vrot.slane %v613_v45, %v1451_v8  ;;  %v661_v62 = vrot.slane %v1534_v41, %v1463_v12  ;;  %v665_v63 = vrot.slane %v1534_v41, %v1466_v13 }
  0x4e   : > { %v795_v0 = vrot.slane %v1569_v54, %v1451_v8  ;;  %v799_v1 = vrot.slane %v1569_v54, %v1454_v9  ;;  %v803_v2 = vrot.slane %v1572_v55, %v1451_v8  ;;  %v807_v3 = vrot.slane %v1572_v55, %v1454_v9 }
  0x4f   : > { %v1603_v4 = vrot.slane %v617_v52, %v1451_v8  ;;  %v1606_v5 = vrot.slane %v621_v53, %v1451_v8  ;;  %v839_v6 = vrot.slane %v1569_v54, %v1463_v12  ;;  %v843_v14 = vrot.slane %v1569_v54, %v1466_v13 }
  0x50   : > { %v1613_v15 = vrot.slane %v653_v58, %v1463_v12  ;;  %v1616_v16 = vrot.slane %v657_v59, %v1463_v12  ;;  %v847_v9 = vrot.slane %v1572_v55, %v1463_v12  ;;  %v851_v17 = vrot.slane %v1572_v55, %v1466_v13 }
  0x51   : > { %v1623_v18 = vrot.slane %v661_v62, %v1463_v12  ;;  %v1626_v21 = vrot.slane %v665_v63, %v1463_v12  ;;  %v1629_v22 = vsub.s32 6, %v1448_v7  ;;  %v1632_v27 = vsub.s32 7, %v1448_v7 }
  0x52   : > { %v1635_v28 = vrot.slane %v795_v0, %v1451_v8  ;;  %v1638_v29 = vrot.slane %v799_v1, %v1451_v8  ;;  %v1641_v13 = vrot.slane %v803_v2, %v1451_v8  ;;  %v1644_v30 = vrot.slane %v807_v3, %v1451_v8 }
  0x53   : > { %v1647_v31 = vrot.slane %v839_v6, %v1463_v12  ;;  %v1650_v35 = vrot.slane %v843_v14, %v1463_v12  ;;  %v326_v7 = vrot.slane %v1457_v10, %v1489_v23  ;;  %v334_v36 = vrot.slane %v1460_v11, %v1489_v23 }
  0x54   : > { %v1657_v39 = vrot.slane %v847_v9, %v1463_v12  ;;  %v1660_v40 = vrot.slane %v851_v17, %v1463_v12  ;;  %v370_v8 = vrot.slane %v1457_v10, %v1540_v43  ;;  %v378_v44 = vrot.slane %v1460_v11, %v1540_v43 }
  0x55   : > { %v330_v45 = vrot.slane %v1457_v10, %v1629_v22  ;;  %v338_v52 = vrot.slane %v1460_v11, %v1629_v22  ;;  %v374_v53 = vrot.slane %v1457_v10, %v1632_v27  ;;  %v382_v58 = vrot.slane %v1460_v11, %v1632_v27 }
  0x56   : > { %v511_v12 = vrot.slane %v1479_v19, %v1489_v23  ;;  %v515_v59 = vrot.slane %v1479_v19, %v1629_v22  ;;  %v519_v62 = vrot.slane %v1482_v20, %v1489_v23  ;;  %v523_v63 = vrot.slane %v1482_v20, %v1629_v22 }
  0x57   : > { %v1683_v0 = vrot.slane %v326_v7, %v1489_v23  ;;  %v1686_v10 = vrot.slane %v334_v36, %v1489_v23  ;;  %v555_v11 = vrot.slane %v1479_v19, %v1540_v43  ;;  %v559_v1 = vrot.slane %v1479_v19, %v1632_v27 }
  0x58   : > { %v1693_v2 = vrot.slane %v370_v8, %v1540_v43  ;;  %v1696_v3 = vrot.slane %v378_v44, %v1540_v43  ;;  %v563_v6 = vrot.slane %v1482_v20, %v1540_v43  ;;  %v567_v14 = vrot.slane %v1482_v20, %v1632_v27 }
  0x59   : > { %v1703_v9 = vrot.slane %v330_v45, %v1489_v23  ;;  %v1706_v17 = vrot.slane %v338_v52, %v1489_v23  ;;  %v1709_v19 = vrot.slane %v374_v53, %v1540_v43  ;;  %v1712_v7 = vrot.slane %v382_v58, %v1540_v43 }
  0x5a   : > { %1979 = vst [vmem:[#allocation8_spill] sm:$0xff] %v1693_v2  ;;  %1980 = vst [vmem:[#allocation9_spill] sm:$0xff] %v1696_v3  ;;  %v1715_v36 = vrot.slane %v511_v12, %v1489_v23  ;;  %v1718_v8 = vrot.slane %v515_v59, %v1489_v23  ;;  %v1721_v20 = vrot.slane %v519_v62, %v1489_v23 }
  0x5b   : > { %1981 = vst [vmem:[#allocation10_spill] sm:$0xff] %v1709_v19  ;;  %1982 = vst [vmem:[#allocation11_spill] sm:$0xff] %v1712_v7  ;;  %v1724_v44 = vrot.slane %v523_v63, %v1489_v23  ;;  %v1727_v45 = vrot.slane %v555_v11, %v1540_v43  ;;  %v1730_v52 = vrot.slane %v559_v1, %v1540_v43 }
  0x5c   : > { %1983 = vst [vmem:[#allocation12_spill] sm:$0xff] %v1721_v20  ;;  %v697_v53 = vrot.slane %v1511_v32, %v1489_v23  ;;  %v701_v58 = vrot.slane %v1511_v32, %v1629_v22  ;;  %v1737_v12 = vrot.slane %v563_v6, %v1540_v43  ;;  %v1740_v59 = vrot.slane %v567_v14, %v1540_v43 }
  0x5d   : > { %1984 = vst [vmem:[#allocation13_spill] sm:$0xff] %v1724_v44  ;;  %1985 = vst [vmem:[#allocation14_spill] sm:$0xff] %v1727_v45  ;;  %v705_v62 = vrot.slane %v1534_v41, %v1489_v23  ;;  %v709_v63 = vrot.slane %v1534_v41, %v1629_v22  ;;  %v741_v11 = vrot.slane %v1511_v32, %v1540_v43 }
  0x5e   : > { %1986 = vst [vmem:[#allocation15_spill] sm:$0xff] %v1730_v52  ;;  %1987 = vst [vmem:[#allocation16_spill] sm:$0xff] %v1737_v12  ;;  %v745_v1 = vrot.slane %v1511_v32, %v1632_v27  ;;  %v749_v52 = vrot.slane %v1534_v41, %v1540_v43  ;;  %v753_v6 = vrot.slane %v1534_v41, %v1632_v27 }
  0x5f   : > { %1988 = vst [vmem:[#allocation17_spill] sm:$0xff] %v1740_v59  ;;  %v883_v14 = vrot.slane %v1569_v54, %v1489_v23  ;;  %v887_v59 = vrot.slane %v1569_v54, %v1629_v22  ;;  %v891_v12 = vrot.slane %v1572_v55, %v1489_v23  ;;  %v895_v45 = vrot.slane %v1572_v55, %v1629_v22 }
  0x60   : > { %v927_v32 = vrot.slane %v1569_v54, %v1540_v43  ;;  %v931_v7 = vrot.slane %v1569_v54, %v1632_v27  ;;  %v935_v41 = vrot.slane %v1572_v55, %v1540_v43  ;;  %v939_v3 = vrot.slane %v1572_v55, %v1632_v27 }
  0x61   : > { %v1771_v19 = vrot.slane %v697_v53, %v1489_v23  ;;  %v1774_v2 = vrot.slane %v701_v58, %v1489_v23  ;;  %v1777_v22 = vrot.slane %v705_v62, %v1489_v23  ;;  %v1780_v44 = vrot.slane %v709_v63, %v1489_v23 }
  0x62   : > { %v1783_v54 = vrot.slane %v741_v11, %v1540_v43  ;;  %v1786_v20 = vrot.slane %v745_v1, %v1540_v43  ;;  %v1789_v55 = vrot.slane %v749_v52, %v1540_v43  ;;  %v1792_v27 = vrot.slane %v753_v6, %v1540_v43 }
  0x63   : > { %v1795_v53 = vrot.slane %v883_v14, %v1489_v23  ;;  %v1798_v58 = vrot.slane %v887_v59, %v1489_v23  ;;  %v1801_v62 = vrot.slane %v891_v12, %v1489_v23  ;;  %v1804_v63 = vrot.slane %v895_v45, %v1489_v23 }
  0x64   : > { %1989 = vst [vmem:[#allocation18_spill] sm:$0xff] %v1786_v20  ;;  %1990 = vst [vmem:[#allocation19_spill] sm:$0xff] %v1789_v55  ;;  %v1807_v1 = vrot.slane %v927_v32, %v1540_v43  ;;  %v1810_v52 = vrot.slane %v931_v7, %v1540_v43  ;;  %v1813_v6 = vrot.slane %v935_v41, %v1540_v43 }
  0x65   : > { %1991 = vst [vmem:[#allocation20_spill] sm:$0xff] %v1792_v27  ;;  %v1816_v14 = vrot.slane %v939_v3, %v1540_v43 }
  0x66   : > { %1992 = vst [vmem:[#allocation21_spill] sm:$0xff] %v1807_v1  ;;  %1993 = vst [vmem:[#allocation22_spill] sm:$0xff] %v1810_v52 }
  0x67   : > { %1994 = vst [vmem:[#allocation23_spill] sm:$0xff] %v1813_v6  ;;  %1995 = vst [vmem:[#allocation24_spill] sm:$0xff] %v1816_v14 }
  0xbd   : > { %v212_v11 = vpop.permute.xlu0 %211  ;;  %v229_v27 = vpop.permute.xlu1 %228 }
  0xbe   : > { %v271_v59 = vmul.f32 %v1492_v24, %v212_v11  ;;  %v272_v12 = vmul.f32 %v1495_v25, %v212_v11  ;;  %v273_v23 = vmul.f32 %v1498_v26, %v212_v11  ;;  %v274_v45 = vmul.f32 %v1514_v33, %v212_v11 }
  0xbf   : > { %v456_v32 = vmul.f32 %v1547_v46, %v212_v11  ;;  %v457_v7 = vmul.f32 %v1550_v47, %v212_v11  ;;  %v458_v52 = vmul.f32 %v1553_v48, %v212_v11  ;;  %v459_v41 = vmul.f32 %v1556_v49, %v212_v11 }
  0xc0   : > { %v275_v6 = vadd.f32 %v271_v59, %v229_v27  ;;  %v276_v43 = vadd.f32 %v272_v12, %v229_v27  ;;  %v277_v3 = vadd.f32 %v273_v23, %v229_v27  ;;  %v278_v14 = vadd.f32 %v274_v45, %v229_v27 }
  0xc1   : > { %v460_v24 = vadd.f32 %v456_v32, %v229_v27  ;;  %v461_v1 = vadd.f32 %v457_v7, %v229_v27  ;;  %v462_v25 = vadd.f32 %v458_v52, %v229_v27  ;;  %v463_v55 = vadd.f32 %v459_v41, %v229_v27 }
  0xc2   : > { %v642_v26 = vmul.f32 %v1585_v60, %v212_v11  ;;  %v643_v33 = vmul.f32 %v1588_v61, %v212_v11  ;;  %v644_v46 = vmul.f32 %v1603_v4, %v212_v11  ;;  %v645_v47 = vmul.f32 %v1606_v5, %v212_v11  ;;  %v216_v23 = vpop.permute.xlu0 %215 }
  0xc3   : > { %v828_v48 = vmul.f32 %v1635_v28, %v212_v11  ;;  %v829_v49 = vmul.f32 %v1638_v29, %v212_v11  ;;  %v830_v59 = vmul.f32 %v1641_v13, %v212_v11  ;;  %v831_v12 = vmul.f32 %v1644_v30, %v212_v11 }
  0xc4   : > { %v646_v45 = vadd.f32 %v642_v26, %v229_v27  ;;  %v647_v52 = vadd.f32 %v643_v33, %v229_v27  ;;  %v648_v32 = vadd.f32 %v644_v46, %v229_v27  ;;  %v649_v7 = vadd.f32 %v645_v47, %v229_v27 }
  0xc5   : > { %v832_v60 = vadd.f32 %v828_v48, %v229_v27  ;;  %v833_v41 = vadd.f32 %v829_v49, %v229_v27  ;;  %v834_v61 = vadd.f32 %v830_v59, %v229_v27  ;;  %v835_v20 = vadd.f32 %v831_v12, %v229_v27  ;;  %v220_v59 = vpop.permute.xlu1 %219  ;;  %v1996_v12 = vld [vmem:[#allocation12_spill] sm:$0xff] }
  0xc6   : > { %v315_v4 = vmul.f32 %v1517_v34, %v216_v23  ;;  %v316_v5 = vmul.f32 %v1524_v37, %v216_v23  ;;  %v317_v28 = vmul.f32 %v1527_v38, %v216_v23  ;;  %v318_v29 = vmul.f32 %v1537_v42, %v216_v23 }
  0xc7   : > { %v500_v13 = vmul.f32 %v1559_v50, %v216_v23  ;;  %v501_v30 = vmul.f32 %v1562_v51, %v216_v23  ;;  %v502_v11 = vmul.f32 %v1575_v56, %v216_v23  ;;  %v503_v26 = vmul.f32 %v1578_v57, %v216_v23 }
  0xc8   : > { %v319_v33 = vadd.f32 %v315_v4, %v275_v6  ;;  %v320_v46 = vadd.f32 %v316_v5, %v276_v43  ;;  %v321_v47 = vadd.f32 %v317_v28, %v277_v3  ;;  %v322_v27 = vadd.f32 %v318_v29, %v278_v14  ;;  %v1998_v4 = vld [vmem:[#allocation8_spill] sm:$0xff]  ;;  %v1999_v5 = vld [vmem:[#allocation10_spill] sm:$0xff]  ;;  %v2000_v28 = vld [vmem:[#allocation9_spill] sm:$0xff] }
  0xc9   : > { %v504_v48 = vadd.f32 %v500_v13, %v460_v24  ;;  %v505_v34 = vadd.f32 %v501_v30, %v461_v1  ;;  %v506_v49 = vadd.f32 %v502_v11, %v462_v25  ;;  %v507_v37 = vadd.f32 %v503_v26, %v463_v55  ;;  %v2001_v29 = vld [vmem:[#allocation11_spill] sm:$0xff] }
  0xca   : > { %v686_v38 = vmul.f32 %v1613_v15, %v216_v23  ;;  %v687_v42 = vmul.f32 %v1616_v16, %v216_v23  ;;  %v688_v50 = vmul.f32 %v1623_v18, %v216_v23  ;;  %v689_v51 = vmul.f32 %v1626_v21, %v216_v23 }
  0xcb   : > { %v872_v56 = vmul.f32 %v1647_v31, %v216_v23  ;;  %v873_v57 = vmul.f32 %v1650_v35, %v216_v23  ;;  %v874_v6 = vmul.f32 %v1657_v39, %v216_v23  ;;  %v875_v14 = vmul.f32 %v1660_v40, %v216_v23 }
  0xcc   : > { %v690_v1 = vadd.f32 %v686_v38, %v646_v45  ;;  %v691_v43 = vadd.f32 %v687_v42, %v647_v52  ;;  %v692_v55 = vadd.f32 %v688_v50, %v648_v32  ;;  %v693_v3 = vadd.f32 %v689_v51, %v649_v7  ;;  %v1997_v45 = vld [vmem:[#allocation13_spill] sm:$0xff]  ;;  %v224_v7 = vpop.permute.xlu1 %223 }
  0xcd   : > { %v1850_v24 = vadd.f32 %v872_v56, %v832_v60  ;;  %v1852_v15 = vadd.f32 %v873_v57, %v833_v41  ;;  %v1854_v16 = vadd.f32 %v874_v6, %v834_v61  ;;  %v1856_v18 = vadd.f32 %v875_v14, %v835_v20  ;;  %v2005_v50 = vld [vmem:[#allocation17_spill] sm:$0xff] }
  0xce   : > { %v359_v21 = vmul.f32 %v1683_v0, %v220_v59  ;;  %v360_v31 = vmul.f32 %v1703_v9, %v220_v59  ;;  %v361_v35 = vmul.f32 %v1686_v10, %v220_v59  ;;  %v362_v39 = vmul.f32 %v1706_v17, %v220_v59 }
  0xcf   : > { %v544_v40 = vmul.f32 %v1715_v36, %v220_v59  ;;  %v545_v25 = vmul.f32 %v1718_v8, %v220_v59  ;;  %v546_v23 = vmul.f32 %v1996_v12, %v220_v59  ;;  %v547_v52 = vmul.f32 %v1997_v45, %v220_v59 }
  0xd0   : > { %v730_v32 = vmul.f32 %v1771_v19, %v220_v59  ;;  %v731_v20 = vmul.f32 %v1774_v2, %v220_v59  ;;  %v732_v0 = vmul.f32 %v1777_v22, %v220_v59  ;;  %v733_v9 = vmul.f32 %v1780_v44, %v220_v59 }
  0xd1   : > { %v916_v10 = vmul.f32 %v1795_v53, %v220_v59  ;;  %v917_v17 = vmul.f32 %v1798_v58, %v220_v59  ;;  %v918_v36 = vmul.f32 %v1801_v62, %v220_v59  ;;  %v919_v8 = vmul.f32 %v1804_v63, %v220_v59  ;;  %v2004_v59 = vld [vmem:[#allocation16_spill] sm:$0xff] }
  0xd2   : > { %v363_v60 = vadd.f32 %v359_v21, %v319_v33  ;;  %v364_v41 = vadd.f32 %v360_v31, %v320_v46  ;;  %v365_v61 = vadd.f32 %v361_v35, %v321_v47  ;;  %v366_v19 = vadd.f32 %v362_v39, %v322_v27  ;;  %v2002_v33 = vld [vmem:[#allocation14_spill] sm:$0xff]  ;;  %v2003_v47 = vld [vmem:[#allocation15_spill] sm:$0xff] }
  0xd3   : > { %v403_v2 = vmul.f32 %v1998_v4, %v224_v7  ;;  %v404_v22 = vmul.f32 %v1999_v5, %v224_v7  ;;  %v405_v44 = vmul.f32 %v2000_v28, %v224_v7  ;;  %v406_v13 = vmul.f32 %v2001_v29, %v224_v7  ;;  %v2006_v31 = vld [vmem:[#allocation18_spill] sm:$0xff]  ;;  %v2007_v39 = vld [vmem:[#allocation19_spill] sm:$0xff] }
  0xd4   : > { %v548_v30 = vadd.f32 %v544_v40, %v504_v48  ;;  %v549_v53 = vadd.f32 %v545_v25, %v505_v34  ;;  %v550_v11 = vadd.f32 %v546_v23, %v506_v49  ;;  %v551_v58 = vadd.f32 %v547_v52, %v507_v37  ;;  %v2008_v25 = vld [vmem:[#allocation20_spill] sm:$0xff] }
  0xd5   : > { %v407_v26 = vadd.f32 %v403_v2, %v363_v60  ;;  %v408_v62 = vadd.f32 %v404_v22, %v364_v41  ;;  %v409_v38 = vadd.f32 %v405_v44, %v365_v61  ;;  %v410_v63 = vadd.f32 %v406_v13, %v366_v19 }
  0xd6   : > { %v588_v46 = vmul.f32 %v2002_v33, %v224_v7  ;;  %v589_v27 = vmul.f32 %v2003_v47, %v224_v7  ;;  %v590_v42 = vmul.f32 %v2004_v59, %v224_v7  ;;  %v591_v51 = vmul.f32 %v2005_v50, %v224_v7 }
  0xd7   : > { %411 = vst [vmem:[%s1883_s19] sm:$0xff] %v407_v26  ;;  %412 = vst [vmem:[%s1883_s19 + $0x8] sm:$0xff] %v408_v62  ;;  %v734_v48 = vadd.f32 %v730_v32, %v690_v1  ;;  %v735_v34 = vadd.f32 %v731_v20, %v691_v43  ;;  %v736_v49 = vadd.f32 %v732_v0, %v692_v55  ;;  %v2009_v32 = vld [vmem:[#allocation21_spill] sm:$0xff]  ;;  %v2010_v0 = vld [vmem:[#allocation22_spill] sm:$0xff] }
  0xd8   : > { %413 = vst [vmem:[%s1883_s19 + $0x10] sm:$0xff] %v409_v38  ;;  %414 = vst [vmem:[%s1883_s19 + $0x18] sm:$0xff] %v410_v63  ;;  %v737_v37 = vadd.f32 %v733_v9, %v693_v3  ;;  %v592_v56 = vadd.f32 %v588_v46, %v548_v30  ;;  %v593_v57 = vadd.f32 %v589_v27, %v549_v53  ;;  %v2011_v9 = vld [vmem:[#allocation23_spill] sm:$0xff] }
  0xd9   : > { %v594_v6 = vadd.f32 %v590_v42, %v550_v11  ;;  %v595_v14 = vadd.f32 %v591_v51, %v551_v58  ;;  %v774_v21 = vmul.f32 %v1783_v54, %v224_v7  ;;  %v775_v35 = vmul.f32 %v2006_v31, %v224_v7 }
  0xda   : > { %v776_v40 = vmul.f32 %v2007_v39, %v224_v7  ;;  %v777_v12 = vmul.f32 %v2008_v25, %v224_v7  ;;  %1086 = vst [vmem:[%s1883_s19 + $0x20] sm:$0xff] %v592_v56  ;;  %1087 = vst [vmem:[%s1883_s19 + $0x28] sm:$0xff] %v593_v57  ;;  %v920_v1 = vadd.f32 %v916_v10, %v1850_v24  ;;  %v2012_v10 = vld [vmem:[#allocation24_spill] sm:$0xff] }
  0xdb   : > { %1088 = vst [vmem:[%s1883_s19 + $0x30] sm:$0xff] %v594_v6  ;;  %1089 = vst [vmem:[%s1883_s19 + $0x38] sm:$0xff] %v595_v14  ;;  %v921_v43 = vadd.f32 %v917_v17, %v1852_v15  ;;  %v922_v54 = vadd.f32 %v918_v36, %v1854_v16  ;;  %v923_v55 = vadd.f32 %v919_v8, %v1856_v18 }
  0xdc   : > { %v778_v3 = vadd.f32 %v774_v21, %v734_v48  ;;  %v779_v23 = vadd.f32 %v775_v35, %v735_v34  ;;  %v780_v45 = vadd.f32 %v776_v40, %v736_v49  ;;  %v781_v52 = vadd.f32 %v777_v12, %v737_v37 }
  0xdd   : > { %v960_v20 = vmul.f32 %v2009_v32, %v224_v7  ;;  %v961_v24 = vmul.f32 %v2010_v0, %v224_v7  ;;  %v962_v15 = vmul.f32 %v2011_v9, %v224_v7  ;;  %v963_v16 = vmul.f32 %v2012_v10, %v224_v7 }
  0xde   : > { %1092 = vst [vmem:[%s1883_s19 + $0x40] sm:$0xff] %v778_v3  ;;  %1093 = vst [vmem:[%s1883_s19 + $0x48] sm:$0xff] %v779_v23 }
  0xdf   : > { %1094 = vst [vmem:[%s1883_s19 + $0x50] sm:$0xff] %v780_v45  ;;  %1095 = vst [vmem:[%s1883_s19 + $0x58] sm:$0xff] %v781_v52  ;;  %v964_v18 = vadd.f32 %v960_v20, %v920_v1  ;;  %v965_v17 = vadd.f32 %v961_v24, %v921_v43  ;;  %v966_v36 = vadd.f32 %v962_v15, %v922_v54 }
  0xe0   : > { %v967_v8 = vadd.f32 %v963_v16, %v923_v55 }
  0xe1   : > { %1098 = vst [vmem:[%s1883_s19 + $0x60] sm:$0xff] %v964_v18  ;;  %1099 = vst [vmem:[%s1883_s19 + $0x68] sm:$0xff] %v965_v17 }
  0xe2   : > { %1100 = vst [vmem:[%s1883_s19 + $0x70] sm:$0xff] %v966_v36  ;;  %1101 = vst [vmem:[%s1883_s19 + $0x78] sm:$0xff] %v967_v8 }
  0xe3   : > { %1224 = shalt.err (!%p1221_p6)
}
  0xe4   : > { %s1225_s5 = scalar_lea.hbm %s1914_s28, 2048  ;;  %s1229_s8 = scalar_lea.hbm %s1970_s3, 4096 }
  0xe5   : > { %p1226_p4 = scmp.ne.s32.totalorder %s1914_s28, %s1225_s5  ;;  %p1230_p1 = scmp.lt.u32.totalorder %s1914_s28, %s1970_s3 }
  0xe6   : > { %p1231_p2 = scmp.lt.u32.totalorder %s1229_s8, %s1225_s5  ;;  %p1233_p8 = scmp.lt.u32.totalorder %s1225_s5, %s1914_s28 }
  0xe7   : > { %p1227_p10 = pnand %p1226_p4, %p2013_p9 }
  0xe8   : > { %p1232_p5 = por %p1231_p2, %p1230_p1 }
  0xe9   : > { %p1228_p12 = pneg %p1227_p10 }
  0xea   : > { %p1234_p11 = por %p1233_p8, %p1232_p5 }
  0xec   : > { %p1235_p0 = pnand %p1234_p11, %p1228_p12 }
  0xee   : > { %1238 = shalt.err (!%p1235_p0)
}
  0xef   : > { %1111 = dma.vmem_to_hbm [thread:$0]  (%p2013_p9), %s1916_s22, 2048, %s1914_s28, %s974_s29  }
  0xf0 PF: > { %s1002_s24 = sand.u32 1, %s1273_s12   ;;  %p2014_p7 = scmp.ne.s32.totalorder %s1975_s27, 0 }
  0xf1   : > { %p2015_p13 = scmp.ge.s32.totalorder %s1293_s17, 2  ;;  %s1003_s19 = scalar_lea.sflag [#allocation4], %s1002_s24 }
  0xf3   : > { %p1118_p3 = pnand %p2015_p13, %p2014_p7 }
  0xf5   : > { %1268 = dma.done.wait (!%p1118_p3), %s1003_s19, 2048  }
  0xf6   : > { %1270 = vsyncadd (!%p1118_p3), %s1003_s19, 4294965248  ;;  %s19_s17 = sadd.s32 1, %s1293_s17   ;;  %s2016_s12 = smov %s1277_s13 }
  0xf7   : > { %p16_p6 = scmp.ge.s32.totalorder %s19_s17, 4   ;;  %s2017_s13 = smov %s1281_s14 }
  0xf8   : > { %s2018_s14 = smov %s1377_s26  ;;  %s2019_s15 = smov %s1289_s16 }
  0xf9   : > { %s2020_s16 = smov %s2022_s20  ;;  %18 = sbr.rel (!%p16_p6) target bundleno = 6 (0x6), region = 83 }
 0x100   :  { %1008 = vsyncpa [#allocation3], 1 }
 0x101   :  { %1010 = vsyncpa [#allocation3 + $0x1], 1 }
 0x102   :  { %1011 = vsyncpa [#allocation4], 1 }
 0x103   :  { %1013 = vsyncpa [#allocation4 + $0x1], 1 }

</bundles_post_ra>
